<compile_context>
chip_gen: v5e
topology: v5e:2x2
jax: 0.10.0
libtpu: 0.0.40
codegen_flags: <defaults>
</compile_context>

<pallas_src>
import functools

import jax
import jax.numpy as jnp
from jax.experimental import pallas as pl
from jax.experimental.pallas import tpu as pltpu


def _softiou_kernel(logit_ref, tgt_ref, inter_ref, psum_ref, *,
                    hw, ts, num_tiles, tiles_per_split, needs_mask):
    i = pl.program_id(2)

    # Zero the per-(image, split) accumulator slabs on the first pixel tile.
    @pl.when(i == 0)
    def _():
        inter_ref[...] = jnp.zeros_like(inter_ref)
        psum_ref[...] = jnp.zeros_like(psum_ref)

    x = logit_ref[...].astype(jnp.float32)        # (C, TS, 128)
    tgt = tgt_ref[...].astype(jnp.int32)          # (1, TS, 128)
    c = x.shape[0]

    # Numerically stable softmax over the class axis (leading, non-vreg axis
    # => pure VPU adds/maxes over C dense slabs; exp / reciprocal on the EUP).
    m = jnp.max(x, axis=0, keepdims=True)         # (1, TS, 128)
    e = jnp.exp(x - m)                            # (C, TS, 128)
    den = jnp.sum(e, axis=0, keepdims=True)       # (1, TS, 128)
    pred = e * pl.reciprocal(den, approx=True)    # EUP reciprocal (free slot)

    # One-hot fused into a select: no one-hot slab, no convert, no multiply.
    cls_ids = jax.lax.broadcasted_iota(jnp.int32, (c, ts, 128), 0)
    inter = jnp.where(cls_ids == tgt, pred, 0.0)  # pred where tgt == class

    def reduce_rows(v):
        # (C, TS, 128) -> (C, 8, 128) sublane-group partial sum: static
        # 8-row slices + log-depth tree of plain VPU vreg adds (no XLU, no
        # reshape). Keeps the accumulator loads/stores independent of TS.
        if ts % 8 != 0 or ts == 8:
            return v
        parts = [v[:, j * 8:(j + 1) * 8, :] for j in range(ts // 8)]
        while len(parts) > 1:
            nxt = [parts[k] + parts[k + 1] for k in range(0, len(parts) - 1, 2)]
            if len(parts) % 2:
                nxt.append(parts[-1])
            parts = nxt
        return parts[0]

    if not needs_mask:
        # Common case (H*W % 128 == 0 and ts | R): no tail masking at all.
        inter_ref[...] += reduce_rows(inter)
        psum_ref[...] += reduce_rows(pred)
    else:
        tile_idx = pl.program_id(1) * tiles_per_split + i
        is_last = tile_idx == num_tiles - 1

        @pl.when(tile_idx < num_tiles - 1)
        def _():
            inter_ref[...] += reduce_rows(inter)
            psum_ref[...] += reduce_rows(pred)

        # Only the globally-last pixel tile can hold padded / ragged pixels;
        # the iota + select work is confined to it.
        @pl.when(is_last)
        def _():
            row = jax.lax.broadcasted_iota(jnp.int32, (1, ts, 128), 1)
            lane = jax.lax.broadcasted_iota(jnp.int32, (1, ts, 128), 2)
            pix = (tile_idx * ts + row) * 128 + lane
            valid = pix < hw
            # Select (not multiply) so garbage in masked-out tails cannot
            # propagate NaN/Inf into the accumulators.
            inter_ref[...] += reduce_rows(jnp.where(valid, inter, 0.0))
            psum_ref[...] += reduce_rows(jnp.where(valid, pred, 0.0))


@functools.partial(jax.jit,
                   static_argnames=("num_classes", "naive", "drop_last_class",
                                    "max_tile_rows"))
def soft_iou_loss(logit, target, *, num_classes, naive=False,
                  drop_last_class=False, max_tile_rows=None):
    """logit: (N, C, H, W) float (f32/bf16/f16); target: (N, H, W) int labels."""
    N, C, H, W = logit.shape
    assert C == num_classes
    HW = H * W
    HWp = ((HW + 127) // 128) * 128
    R = HWp // 128

    # Free reshapes only: no NCHW -> CNHW transpose, no dtype upcast (the
    # kernel casts to f32 internally).
    x = jnp.reshape(logit, (N, C, HW))
    t = jnp.reshape(target, (N, 1, HW))
    if HWp != HW:
        # Rare case (H*W not a multiple of 128): pad the pixel axis to a lane
        # multiple; padded pixels are masked out inside the kernel.
        x = jnp.pad(x, ((0, 0), (0, 0), (0, HWp - HW)))
        t = jnp.pad(t, ((0, 0), (0, 0), (0, HWp - HW)))
    x = jnp.reshape(x, (N, C, R, 128))
    t = jnp.reshape(t, (N, 1, R, 128))

    # Generation-aware VMEM budget: v7x has 64 MiB physical VMEM (stay well
    # under it); v5e/v6e have 128 MiB so a larger scoped limit is safe.
    try:
        vmem_cap = int(getattr(pltpu.get_tpu_info(), "vmem_capacity_bytes",
                               64 * 1024 * 1024))
    except Exception:  # interpret mode / unknown backend: be conservative
        vmem_cap = 64 * 1024 * 1024
    if vmem_cap <= 64 * 1024 * 1024:
        vmem_limit = 40 * 1024 * 1024      # v7x-class
    else:
        vmem_limit = 64 * 1024 * 1024      # v5e / v6e

    # Tile size: accumulators no longer scale with ts, so the tile is driven
    # by the double-buffered input tiles plus a few f32 temporaries. Cap at
    # 512 rows (64K pixels) per grid step to amortize per-step overhead.
    logit_bytes = jnp.dtype(logit.dtype).itemsize
    label_bytes = jnp.dtype(target.dtype).itemsize
    bytes_per_row = 128 * ((C * logit_bytes + label_bytes) * 2 + C * 4 * 3)
    input_budget = vmem_limit - 4 * 1024 * 1024
    ts_cap = min(input_budget // bytes_per_row, 512)
    if max_tile_rows is not None:
        ts_cap = min(ts_cap, max_tile_rows)
    ts_cap = max(8, (ts_cap // 8) * 8)
    ts = R if R <= ts_cap else ts_cap

    num_tiles = (R + ts - 1) // ts
    # 2-way "parallel" split of the pixel-tile axis (own accumulator slabs,
    # summed below) so v7x's second TensorCore has work even at N == 1.
    nsplit = 2 if (num_tiles >= 2 and num_tiles % 2 == 0) else 1
    tiles_per_split = num_tiles // nsplit

    needs_mask = (HWp != HW) or (R % ts != 0)
    acc_rows = 8 if ts % 8 == 0 else ts

    kernel = functools.partial(
        _softiou_kernel, hw=HW, ts=ts, num_tiles=num_tiles,
        tiles_per_split=tiles_per_split, needs_mask=needs_mask)

    inter, psum = pl.pallas_call(
        kernel,
        out_shape=(
            jax.ShapeDtypeStruct((N, nsplit, C, acc_rows, 128), jnp.float32),
            jax.ShapeDtypeStruct((N, nsplit, C, acc_rows, 128), jnp.float32),
        ),
        grid=(N, nsplit, tiles_per_split),
        in_specs=[
            pl.BlockSpec((None, C, ts, 128),
                         lambda n, h, i: (n, 0, h * tiles_per_split + i, 0)),
            pl.BlockSpec((None, 1, ts, 128),
                         lambda n, h, i: (n, 0, h * tiles_per_split + i, 0)),
        ],
        out_specs=(
            pl.BlockSpec((None, None, C, acc_rows, 128),
                         lambda n, h, i: (n, h, 0, 0, 0)),
            pl.BlockSpec((None, None, C, acc_rows, 128),
                         lambda n, h, i: (n, h, 0, 0, 0)),
        ),
        compiler_params=pltpu.CompilerParams(
            dimension_semantics=("parallel", "parallel", "arbitrary"),
            vmem_limit_bytes=vmem_limit,
        ),
    )(x, t)

    inter = jnp.sum(inter, axis=(0, 1, 3, 4))      # (C,)  tiny final reduce
    pred_sum = jnp.sum(psum, axis=(0, 1, 3, 4))    # (C,)

    # count_c = #pixels with target == c (out-of-range labels contribute to
    # no class, matching one_hot). Fused compare+reduce: target is read once.
    # Exact algebra: union_c = pred_sum_c + count_c - inter_c.
    tgt_flat = jnp.reshape(target, (-1,)).astype(jnp.int32)
    count = jnp.sum(
        (tgt_flat[:, None] == jnp.arange(C, dtype=jnp.int32)[None, :])
        .astype(jnp.float32), axis=0)              # (C,)
    union = pred_sum + count - inter

    if drop_last_class:
        # PyTorch `experiment in [2, 3]` branch: drop the last class.
        inter, union = inter[:-1], union[:-1]

    if naive:
        loss = jnp.mean(inter / union)   # NOTE: NaN if a union is 0 (matches PyTorch)
    else:
        mask = union != 0
        ratio = jnp.where(mask, inter / jnp.where(mask, union, 1.0), 0.0)
        loss = jnp.sum(ratio) / jnp.maximum(jnp.sum(mask), 1)
    return -loss


def _reference_soft_iou(logit, target, num_classes, naive=False):
    """Pure-JAX reference matching the PyTorch forward (experiment=1)."""
    pred = jax.nn.softmax(logit.astype(jnp.float32), axis=1)        # (N,C,H,W)
    onehot = jax.nn.one_hot(target, num_classes, axis=1,
                            dtype=jnp.float32)                       # (N,C,H,W)
    inter = jnp.sum(pred * onehot, axis=(0, 2, 3))                   # (C,)
    union = jnp.sum(pred + onehot - pred * onehot, axis=(0, 2, 3))   # (C,)
    if naive:
        loss = jnp.mean(inter / union)
    else:
        mask = union != 0
        loss = jnp.sum(jnp.where(mask, inter / union, 0.0)) / jnp.sum(mask)
    return -loss


if __name__ == "__main__":
    # Deterministic synthetic "config": experiment=1 with 4 classes.
    CLASS_INFO = {1: ({}, {0: "bg", 1: "c1", 2: "c2", 3: "c3"})}
    config = {"experiment": 1}
    num_classes = len(CLASS_INFO[config["experiment"]][1])   # 4

    key = jax.random.PRNGKey(0)

    def run_case(shape, max_tile_rows=None):
        N, C, H, W = shape
        k1, k2 = jax.random.split(jax.random.fold_in(key, H * W + N))
        logit = jax.random.normal(k1, (N, C, H, W), dtype=jnp.float32)
        target = jax.random.randint(k2, (N, H, W), 0, C, dtype=jnp.int32)
        loss = soft_iou_loss(logit, target, num_classes=C, naive=False,
                             max_tile_rows=max_tile_rows)
        jax.block_until_ready(loss)
        ref = _reference_soft_iou(logit, target, C, naive=False)
        # Kernel uses the EUP approximate reciprocal for the softmax
        # denominator, so compare at a slightly relaxed tolerance.
        assert jnp.allclose(loss, ref, atol=3e-3, rtol=3e-3), (shape, loss, ref)

    # Basic small case (the module's typical toy shape).
    run_case((2, num_classes, 16, 16))
    # Sublane-reduced (C, 8, 128) accumulators (ts = 32 rows).
    run_case((1, num_classes, 64, 64))
    # Multi-tile reduction + 2-way "parallel" pixel split (v7x megacore path).
    run_case((1, num_classes, 64, 64), max_tile_rows=8)
    # Ragged tail (H*W % 128 != 0): masked last tile.
    run_case((1, num_classes, 24, 24))

    print("KERNEL_OK")
</pallas_src>

<mosaic_0001>
module attributes {stable_mosaic.version = 11 : i64} {
  func.func @_softiou_kernel(%arg0: i32, %arg1: i32, %arg2: i32, %arg3: memref<1x4x2x128xf32, #tpu.memory_space<vmem>>, %arg4: memref<1x1x2x128xi32, #tpu.memory_space<vmem>>, %arg5: memref<1x1x4x2x128xf32, #tpu.memory_space<vmem>>, %arg6: memref<1x1x4x2x128xf32, #tpu.memory_space<vmem>>) attributes {dimension_semantics = [#tpu.dimension_semantics<parallel>, #tpu.dimension_semantics<parallel>, #tpu.dimension_semantics<arbitrary>], iteration_bounds = array<i64: 2, 1, 1>, scalar_prefetch = 0 : i64, scratch_operands = 0 : i64, tpu.core_type = #tpu.core_type<tc>, window_params = [{transform_indices = @transform_0, window_bounds = array<i64: 1, 4, 2, 128>}, {transform_indices = @transform_1, window_bounds = array<i64: 1, 1, 2, 128>}, {transform_indices = @transform_2, window_bounds = array<i64: 1, 1, 4, 2, 128>}, {transform_indices = @transform_3, window_bounds = array<i64: 1, 1, 4, 2, 128>}]} {
    %c0_i32 = arith.constant 0 : i32
    %0 = arith.cmpi eq, %arg2, %c0_i32 : i32
    %1 = arith.extui %0 : i1 to i32
    %c0_i32_0 = arith.constant 0 : i32
    %2 = arith.cmpi ne, %1, %c0_i32_0 : i32
    scf.if %2 {
      %cst_30 = arith.constant 0.000000e+00 : f32
      %34 = vector.broadcast %cst_30 : f32 to vector<4x2x128xf32>
      %c0_31 = arith.constant 0 : index
      %c0_32 = arith.constant 0 : index
      %c0_33 = arith.constant 0 : index
      %c0_34 = arith.constant 0 : index
      %c0_35 = arith.constant 0 : index
      %35 = vector.load %arg5[%c0_31, %c0_32, %c0_33, %c0_34, %c0_35] : memref<1x1x4x2x128xf32, #tpu.memory_space<vmem>>, vector<1x1x4x2x128xf32>
      %36 = vector.shape_cast %35 : vector<1x1x4x2x128xf32> to vector<4x2x128xf32>
      %37 = vector.shape_cast %34 : vector<4x2x128xf32> to vector<1x1x4x2x128xf32>
      tpu.vector_store %arg5[%c0_31, %c0_32, %c0_33, %c0_34, %c0_35], %37 {strides = array<i32>} : memref<1x1x4x2x128xf32, #tpu.memory_space<vmem>>, vector<1x1x4x2x128xf32>,
      %cst_36 = arith.constant 0.000000e+00 : f32
      %38 = vector.broadcast %cst_36 : f32 to vector<4x2x128xf32>
      %c0_37 = arith.constant 0 : index
      %c0_38 = arith.constant 0 : index
      %c0_39 = arith.constant 0 : index
      %c0_40 = arith.constant 0 : index
      %c0_41 = arith.constant 0 : index
      %39 = vector.load %arg6[%c0_37, %c0_38, %c0_39, %c0_40, %c0_41] : memref<1x1x4x2x128xf32, #tpu.memory_space<vmem>>, vector<1x1x4x2x128xf32>
      %40 = vector.shape_cast %39 : vector<1x1x4x2x128xf32> to vector<4x2x128xf32>
      %41 = vector.shape_cast %38 : vector<4x2x128xf32> to vector<1x1x4x2x128xf32>
      tpu.vector_store %arg6[%c0_37, %c0_38, %c0_39, %c0_40, %c0_41], %41 {strides = array<i32>} : memref<1x1x4x2x128xf32, #tpu.memory_space<vmem>>, vector<1x1x4x2x128xf32>,
    } else {
    }
    %c0 = arith.constant 0 : index
    %c0_1 = arith.constant 0 : index
    %c0_2 = arith.constant 0 : index
    %c0_3 = arith.constant 0 : index
    %3 = vector.load %arg3[%c0, %c0_1, %c0_2, %c0_3] : memref<1x4x2x128xf32, #tpu.memory_space<vmem>>, vector<1x4x2x128xf32>
    %4 = vector.shape_cast %3 : vector<1x4x2x128xf32> to vector<4x2x128xf32>
    %c0_4 = arith.constant 0 : index
    %c0_5 = arith.constant 0 : index
    %c0_6 = arith.constant 0 : index
    %c0_7 = arith.constant 0 : index
    %5 = vector.load %arg4[%c0_4, %c0_5, %c0_6, %c0_7] : memref<1x1x2x128xi32, #tpu.memory_space<vmem>>, vector<1x1x2x128xi32>
    %6 = vector.shape_cast %5 : vector<1x1x2x128xi32> to vector<1x2x128xi32>
    %cst = arith.constant dense<0xFF800000> : vector<2x128xf32>
    %7 = vector.multi_reduction <maximumf>, %4, %cst [0] : vector<4x2x128xf32> to vector<2x128xf32>
    %8 = vector.shape_cast %7 : vector<2x128xf32> to vector<1x2x128xf32>
    %9 = vector.broadcast %8 : vector<1x2x128xf32> to vector<4x2x128xf32>
    %10 = arith.subf %4, %9 : vector<4x2x128xf32>
    %11 = math.exp %10 : vector<4x2x128xf32>
    %cst_8 = arith.constant dense<0.000000e+00> : vector<2x128xf32>
    %12 = vector.multi_reduction <add>, %11, %cst_8 [0] : vector<4x2x128xf32> to vector<2x128xf32>
    %13 = vector.shape_cast %12 : vector<2x128xf32> to vector<1x2x128xf32>
    %14 = tpu.reciprocal %13 {approx = true} : vector<1x2x128xf32> -> vector<1x2x128xf32>
    %15 = vector.broadcast %14 : vector<1x2x128xf32> to vector<4x2x128xf32>
    %16 = arith.mulf %11, %15 : vector<4x2x128xf32>
    %17 = tpu.iota {dimensions = array<i32: 0>} : vector<4x2x128xi32>
    %18 = vector.broadcast %6 : vector<1x2x128xi32> to vector<4x2x128xi32>
    %19 = arith.cmpi eq, %17, %18 : vector<4x2x128xi32>
    %cst_9 = arith.constant 0.000000e+00 : f32
    %20 = vector.broadcast %cst_9 : f32 to vector<4x2x128xf32>
    %21 = arith.select %19, %16, %20 : vector<4x2x128xi1>, vector<4x2x128xf32>
    %c0_10 = arith.constant 0 : index
    %c0_11 = arith.constant 0 : index
    %c0_12 = arith.constant 0 : index
    %c0_13 = arith.constant 0 : index
    %c0_14 = arith.constant 0 : index
    %22 = vector.load %arg5[%c0_10, %c0_11, %c0_12, %c0_13, %c0_14] : memref<1x1x4x2x128xf32, #tpu.memory_space<vmem>>, vector<1x1x4x2x128xf32>
    %23 = vector.shape_cast %22 : vector<1x1x4x2x128xf32> to vector<4x2x128xf32>
    %24 = arith.addf %23, %21 : vector<4x2x128xf32>
    %c0_15 = arith.constant 0 : index
    %c0_16 = arith.constant 0 : index
    %c0_17 = arith.constant 0 : index
    %c0_18 = arith.constant 0 : index
    %c0_19 = arith.constant 0 : index
    %25 = vector.load %arg5[%c0_15, %c0_16, %c0_17, %c0_18, %c0_19] : memref<1x1x4x2x128xf32, #tpu.memory_space<vmem>>, vector<1x1x4x2x128xf32>
    %26 = vector.shape_cast %25 : vector<1x1x4x2x128xf32> to vector<4x2x128xf32>
    %27 = vector.shape_cast %24 : vector<4x2x128xf32> to vector<1x1x4x2x128xf32>
    tpu.vector_store %arg5[%c0_15, %c0_16, %c0_17, %c0_18, %c0_19], %27 {strides = array<i32>} : memref<1x1x4x2x128xf32, #tpu.memory_space<vmem>>, vector<1x1x4x2x128xf32>,
    %c0_20 = arith.constant 0 : index
    %c0_21 = arith.constant 0 : index
    %c0_22 = arith.constant 0 : index
    %c0_23 = arith.constant 0 : index
    %c0_24 = arith.constant 0 : index
    %28 = vector.load %arg6[%c0_20, %c0_21, %c0_22, %c0_23, %c0_24] : memref<1x1x4x2x128xf32, #tpu.memory_space<vmem>>, vector<1x1x4x2x128xf32>
    %29 = vector.shape_cast %28 : vector<1x1x4x2x128xf32> to vector<4x2x128xf32>
    %30 = arith.addf %29, %16 : vector<4x2x128xf32>
    %c0_25 = arith.constant 0 : index
    %c0_26 = arith.constant 0 : index
    %c0_27 = arith.constant 0 : index
    %c0_28 = arith.constant 0 : index
    %c0_29 = arith.constant 0 : index
    %31 = vector.load %arg6[%c0_25, %c0_26, %c0_27, %c0_28, %c0_29] : memref<1x1x4x2x128xf32, #tpu.memory_space<vmem>>, vector<1x1x4x2x128xf32>
    %32 = vector.shape_cast %31 : vector<1x1x4x2x128xf32> to vector<4x2x128xf32>
    %33 = vector.shape_cast %30 : vector<4x2x128xf32> to vector<1x1x4x2x128xf32>
    tpu.vector_store %arg6[%c0_25, %c0_26, %c0_27, %c0_28, %c0_29], %33 {strides = array<i32>} : memref<1x1x4x2x128xf32, #tpu.memory_space<vmem>>, vector<1x1x4x2x128xf32>,
    return
  }
  func.func @transform_0(%arg0: i32, %arg1: i32, %arg2: i32) -> (i32, i32, i32, i32) {
    %c1_i32 = arith.constant 1 : i32
    %0 = arith.muli %arg1, %c1_i32 : i32
    %1 = arith.addi %0, %arg2 : i32
    %c0_i32 = arith.constant 0 : i32
    %c0_i32_0 = arith.constant 0 : i32
    %c0_i32_1 = arith.constant 0 : i32
    return %arg0, %c0_i32, %1, %c0_i32_0 : i32, i32, i32, i32
  }
  func.func @transform_1(%arg0: i32, %arg1: i32, %arg2: i32) -> (i32, i32, i32, i32) {
    %c1_i32 = arith.constant 1 : i32
    %0 = arith.muli %arg1, %c1_i32 : i32
    %1 = arith.addi %0, %arg2 : i32
    %c0_i32 = arith.constant 0 : i32
    %c0_i32_0 = arith.constant 0 : i32
    %c0_i32_1 = arith.constant 0 : i32
    return %arg0, %c0_i32, %1, %c0_i32_0 : i32, i32, i32, i32
  }
  func.func @transform_2(%arg0: i32, %arg1: i32, %arg2: i32) -> (i32, i32, i32, i32, i32) {
    %c0_i32 = arith.constant 0 : i32
    %c0_i32_0 = arith.constant 0 : i32
    %c0_i32_1 = arith.constant 0 : i32
    %c0_i32_2 = arith.constant 0 : i32
    return %arg0, %arg1, %c0_i32, %c0_i32_0, %c0_i32_1 : i32, i32, i32, i32, i32
  }
  func.func @transform_3(%arg0: i32, %arg1: i32, %arg2: i32) -> (i32, i32, i32, i32, i32) {
    %c0_i32 = arith.constant 0 : i32
    %c0_i32_0 = arith.constant 0 : i32
    %c0_i32_1 = arith.constant 0 : i32
    %c0_i32_2 = arith.constant 0 : i32
    return %arg0, %arg1, %c0_i32, %c0_i32_0, %c0_i32_1 : i32, i32, i32, i32, i32
  }
}

</mosaic_0001>

<bundles_post_ra>
// kernel: eq.8
= control target key start
LH: loop header
LB: loop body
LE: loop exit
PB: predicated region body
PF: predicated region fallthrough
CT: control target
= control target key end

     0   :  { %s67_s8 = smov 112   ;;  %s68_s11 = smov 80   ;;  %vm3_vm0 = vcmask 130048   ;;  %vm9_vm1 = vcmask 1048448   ;;  %vm15_vm2 = vcmask 917248   ;;  %vm21_vm3 = vcmask 786048   ;;  %s111_s0 = inlined_call_operand.vmem [shape: s32[2,16,16], index: 0, kind: input, shape index: {}]   ;;  %s112_s1 = inlined_call_operand.vmem [shape: s32[512], index: 1, kind: output, shape index: {}]  }
   0x1   :  { %v53_v0 = vld [vmem:[%s111_s0 + $0x7] ss:$8 sm:$0xf]   ;;  %v55_v1 = vld [vmem:[%s111_s0 + $0x5] ss:$8 sm:$0xf]  }
   0x2   :  { %7 = vrot.lane.b32.xlu0 %v53_v0, %s67_s8  ;;  %19 = vrot.lane.b32.xlu1 %v55_v1, %s68_s11  ;;  %v57_v2 = vld [vmem:[%s111_s0 + $0x3] ss:$8 sm:$0xf]   ;;  %s69_s14 = smov 48   ;;  %s70_s19 = smov 96   ;;  %vm27_vm4 = vcmask 654848  }
   0x3   :  { %31 = vrot.lane.b32.xlu2 %v57_v2, %s69_s14  ;;  %v54_v3 = vld [vmem:[%s111_s0 + $0x6] ss:$8 sm:$0xf]   ;;  %v56_v4 = vld [vmem:[%s111_s0 + $0x4] ss:$8 sm:$0xf]  }
   0x4   :  { %s71_s20 = smov 64   ;;  %v58_v5 = vld [vmem:[%s111_s0 + $0x2] ss:$8 sm:$0xf]   ;;  %s72_s23 = smov 32   ;;  %vm33_vm5 = vcmask 523648  }
   0x5   :  { %v59_v6 = vld [vmem:[%s111_s0 + $0x1] ss:$8 sm:$0xf]   ;;  %s73_s26 = smov 16   ;;  %vm39_vm6 = vcmask 392448   ;;  %vm45_vm7 = vcmask 261248  }
   0x6   :  { %v2_v7 = vld [vmem:[%s111_s0] ss:$8 sm:$0xf]  }
   0x7   :  { %4 = vst.msk [vmem:[#allocation0] sm:$0xf] %vm3_vm0, %v2_v7  }
   0xa   :  { %13 = vrot.lane.b32.xlu0 %v54_v3, %s70_s19  ;;  %25 = vrot.lane.b32.xlu1 %v56_v4, %s71_s20 }
   0xb   :  { %37 = vrot.lane.b32.xlu2 %v58_v5, %s72_s23 }
  0x12   :  { %43 = vrot.lane.b32.xlu0 %v59_v6, %s73_s26 }
  0x5d   :  { %v32_v8 = vpop.permute.xlu2 %31  }
  0x65   :  { %v38_v9 = vpop.permute.xlu2 %37  }
  0x74   :  { %v8_v10 = vpop.permute.xlu0 %7   ;;  %v20_v11 = vpop.permute.xlu1 %19  }
  0x75   :  { %10 = vst.msk [vmem:[#allocation0] sm:$0xf] %vm9_vm1, %v8_v10  }
  0x7c   :  { %v14_v12 = vpop.permute.xlu0 %13   ;;  %v26_v13 = vpop.permute.xlu1 %25  }
  0x7d   :  { %16 = vst.msk [vmem:[#allocation0] sm:$0xf] %vm15_vm2, %v14_v12  }
  0x7e   :  { %22 = vst.msk [vmem:[#allocation0] sm:$0xf] %vm21_vm3, %v20_v11  }
  0x7f   :  { %28 = vst.msk [vmem:[#allocation0] sm:$0xf] %vm27_vm4, %v26_v13  }
  0x80   :  { %34 = vst.msk [vmem:[#allocation0] sm:$0xf] %vm33_vm5, %v32_v8  }
  0x81   :  { %40 = vst.msk [vmem:[#allocation0] sm:$0xf] %vm39_vm6, %v38_v9  }
  0x84   :  { %v44_v14 = vpop.permute.xlu0 %43  }
  0x85   :  { %46 = vst.msk [vmem:[#allocation0] sm:$0xf] %vm45_vm7, %v44_v14  }
  0x8c   :  { %v49_v15 = vld [vmem:[#allocation0] sm:$0xf] }
  0x8d   :  { %52 = vst [vmem:[%s112_s1] sm:$0xf] %v49_v15 }

// kernel: soft_iou_loss.1
= control target key start
LH: loop header
LB: loop body
LE: loop exit
PB: predicated region body
PF: predicated region fallthrough
CT: control target
= control target key end

     0   :  { %s614_s12 = smov 0   ;;  %s616_s13 = smov 0   ;;  %s693_s0 = inlined_call_operand.vmem [shape: f32[2,4,2,128], index: 0, kind: input, shape index: {}]   ;;  %s694_s1 = inlined_call_operand.vmem [shape: s32[2,1,2,128], index: 1, kind: input, shape index: {}]   ;;  %s695_s2 = inlined_call_operand.vmem [shape: f32[2,1,4,2,128], index: 2, kind: output, shape index: {0}]   ;;  %s696_s3 = inlined_call_operand.vmem [shape: f32[2,1,4,2,128], index: 3, kind: output, shape index: {1}]  }
   0x1   :  { %s618_s14 = smov 0  }
   0x2 LB: > { %s33_s15 = sadd.s32 1, %s587_s13  ;;  %p521_p0 = scmp.ge.s32.totalorder %s591_s14, 1  ;;  %s591_s14 = sphi %s618_s14, %s14_s14   ;;  %s587_s13 = sphi %s616_s13, %s698_s13   ;;  %s583_s12 = sphi %s614_s12, %s697_s12  }
   0x3   : > { %p35_p1 = scmp.ge.s32.totalorder %s33_s15, 2  ;;  %p190_p2 = scmp.lt.s32.totalorder %s591_s14, 3 }
   0x5   : > { %s700_s15 = smov (%p35_p1, %s33_s15), 0  ;;  %p191_p3 = pnand %p521_p0, %p190_p2 }
   0x6   : > { %p240_p4 = scmp.lt.s32.totalorder (!%p191_p3), %s583_s12, 1 }
   0x7   : > { %194 = sbr.rel (%p191_p3) target bundleno = 61 (0x3d), region = 28 }
   0xc   : > { %s702_s12 = smov (!%p240_p4, %s583_s12), 1  ;;  %v593_v0 = vmov 0.0   ;;  %vm293_vm0 = vcmask 1041408  }
   0xd   : > { %s531_s16 = sshll.u32 %s702_s12, 3  ;;  %s524_s26 = sshll.u32 %s702_s12, 1 }
   0xe   : > { %s638_s19 = scalar_lea.vmem %s695_s2, %s531_s16  ;;  %s247_s22 = scalar_lea.vmem %s693_s0, %s531_s16 }
   0xf   : > { %280 = vst [vmem:[%s638_s19] sm:$0x3] %v593_v0  ;;  %s648_s25 = scalar_lea.vmem %s696_s3, %s531_s16  ;;  %v288_v1 = vld [vmem:[%s247_s22] sm:$0x3]  ;;  %v289_v2 = vld [vmem:[%s247_s22 + $0x2] sm:$0x3]  ;;  %s256_s29 = scalar_lea.vmem %s694_s1, %s524_s26 }
  0x10   : > { %281 = vst [vmem:[%s638_s19 + $0x2] sm:$0x3] %v593_v0  ;;  %v290_v3 = vld [vmem:[%s247_s22 + $0x4] sm:$0x3]  ;;  %v291_v4 = vld [vmem:[%s247_s22 + $0x6] sm:$0x3] }
  0x11   : > { %282 = vst [vmem:[%s638_s19 + $0x4] sm:$0x3] %v593_v0  ;;  %v294_v5 = vsel %vm293_vm0, %v288_v1, -inf  ;;  %v295_v6 = vsel %vm293_vm0, %v289_v2, -inf  ;;  %v296_v7 = vsel %vm293_vm0, %v290_v3, -inf  ;;  %v297_v8 = vsel %vm293_vm0, %v291_v4, -inf }
  0x12   : > { %283 = vst [vmem:[%s638_s19 + $0x6] sm:$0x3] %v593_v0  ;;  %v298_v9 = vmax.f32 %v294_v5, %v295_v6  ;;  %v299_v10 = vmax.f32 %v296_v7, %v297_v8  ;;  %v292_v31 = vld [vmem:[%s256_s29] sm:$0x3] }
  0x13   : > { %284 = vst [vmem:[%s648_s25] sm:$0x3] %v593_v0  ;;  %vm325_vm1 = vcmp.eq.s32.totalorder %v292_v31, 0  ;;  %vm326_vm2 = vcmp.eq.s32.totalorder %v292_v31, 1  ;;  %vm327_vm3 = vcmp.eq.s32.totalorder %v292_v31, 2  ;;  %vm328_vm4 = vcmp.eq.s32.totalorder %v292_v31, 3 }
  0x14   : > { %285 = vst [vmem:[%s648_s25 + $0x2] sm:$0x3] %v593_v0  ;;  %v300_v11 = vmax.f32 %v298_v9, %v299_v10 }
  0x15   : > { %286 = vst [vmem:[%s648_s25 + $0x4] sm:$0x3] %v593_v0 }
  0x16   : > { %287 = vst [vmem:[%s648_s25 + $0x6] sm:$0x3] %v593_v0  ;;  %v301_v12 = vsub.f32 %v288_v1, %v300_v11  ;;  %v302_v13 = vsub.f32 %v289_v2, %v300_v11  ;;  %v303_v14 = vsub.f32 %v290_v3, %v300_v11  ;;  %v304_v15 = vsub.f32 %v291_v4, %v300_v11  ;;  %v333_v34 = vld [vmem:[%s638_s19] sm:$0x3] }
  0x17   : > { %v334_v36 = vld [vmem:[%s638_s19 + $0x2] sm:$0x3] }
  0x18   : > { %v305_v16 = vmul.f32 1.442695, %v301_v12  ;;  %v307_v17 = vmul.f32 1.442695, %v302_v13  ;;  %v309_v18 = vmul.f32 1.442695, %v303_v14 }
  0x19   : > { %v311_v19 = vmul.f32 1.442695, %v304_v15  ;;  %v335_v38 = vld [vmem:[%s638_s19 + $0x4] sm:$0x3]  ;;  %v336_v40 = vld [vmem:[%s638_s19 + $0x6] sm:$0x3] }
  0x1a   : > { %559 = vpow2.f32 %v305_v16  ;;  %v345_v45 = vld [vmem:[%s648_s25] sm:$0x3] }
  0x1b   : > { %561 = vpow2.f32 %v307_v17  ;;  %v346_v49 = vld [vmem:[%s648_s25 + $0x2] sm:$0x3] }
  0x1c   : > { %563 = vpow2.f32 %v309_v18  ;;  %v347_v51 = vld [vmem:[%s648_s25 + $0x4] sm:$0x3] }
  0x1d   : > { %565 = vpow2.f32 %v311_v19  ;;  %v348_v53 = vld [vmem:[%s648_s25 + $0x6] sm:$0x3] }
  0x20   : > { %v560_v20 = vpop.eup %559 }
  0x21   : > { %v562_v21 = vpop.eup %561  ;;  %v313_v22 = vsel %vm293_vm0, %v560_v20, 0.0 }
  0x22   : > { %v564_v23 = vpop.eup %563  ;;  %v314_v24 = vsel %vm293_vm0, %v562_v21, 0.0 }
  0x23   : > { %v566_v25 = vpop.eup %565  ;;  %v315_v26 = vadd.f32 %v314_v24, %v313_v22  ;;  %v316_v27 = vsel %vm293_vm0, %v564_v23, 0.0 }
  0x24   : > { %v318_v28 = vsel %vm293_vm0, %v566_v25, 0.0 }
  0x25   : > { %v317_v29 = vadd.f32 %v316_v27, %v315_v26 }
  0x27   : > { %v319_v30 = vadd.f32 %v318_v28, %v317_v29 }
  0x29   : > { %567 = vrcp.f32 %v319_v30 }
  0x2f   : > { %v568_v32 = vpop.eup %567 }
  0x30   : > { %v321_v33 = vmul.f32 %v568_v32, %v560_v20  ;;  %v322_v35 = vmul.f32 %v568_v32, %v562_v21  ;;  %v323_v37 = vmul.f32 %v568_v32, %v564_v23  ;;  %v324_v39 = vmul.f32 %v568_v32, %v566_v25 }
  0x32   : > { %v329_v41 = vsel %vm325_vm1, %v321_v33, 0.0  ;;  %v330_v42 = vsel %vm326_vm2, %v322_v35, 0.0  ;;  %v331_v43 = vsel %vm327_vm3, %v323_v37, 0.0  ;;  %v332_v44 = vsel %vm328_vm4, %v324_v39, 0.0 }
  0x33   : > { %v337_v46 = vadd.f32 %v333_v34, %v329_v41  ;;  %v338_v47 = vadd.f32 %v334_v36, %v330_v42  ;;  %v339_v48 = vadd.f32 %v335_v38, %v331_v43  ;;  %v340_v50 = vadd.f32 %v336_v40, %v332_v44 }
  0x34   : > { %v349_v52 = vadd.f32 %v345_v45, %v321_v33  ;;  %v350_v54 = vadd.f32 %v346_v49, %v322_v35  ;;  %v351_v55 = vadd.f32 %v347_v51, %v323_v37  ;;  %v352_v56 = vadd.f32 %v348_v53, %v324_v39 }
  0x35   : > { %341 = vst [vmem:[%s638_s19] sm:$0x3] %v337_v46 }
  0x36   : > { %342 = vst [vmem:[%s638_s19 + $0x2] sm:$0x3] %v338_v47 }
  0x37   : > { %343 = vst [vmem:[%s638_s19 + $0x4] sm:$0x3] %v339_v48 }
  0x38   : > { %344 = vst [vmem:[%s638_s19 + $0x6] sm:$0x3] %v340_v50 }
  0x39   : > { %353 = vst [vmem:[%s648_s25] sm:$0x3] %v349_v52 }
  0x3a   : > { %354 = vst [vmem:[%s648_s25 + $0x2] sm:$0x3] %v350_v54 }
  0x3b   : > { %355 = vst [vmem:[%s648_s25 + $0x4] sm:$0x3] %v351_v55 }
  0x3c   : > { %356 = vst [vmem:[%s648_s25 + $0x6] sm:$0x3] %v352_v56 }
  0x3d PF: > { %s14_s14 = sadd.s32 1, %s591_s14   ;;  %s697_s12 = smov %s587_s13 }
  0x3e   : > { %p11_p5 = scmp.ge.s32.totalorder %s14_s14, 4   ;;  %s698_s13 = smov %s700_s15 }
  0x40   :  { %13 = sbr.rel (!%p11_p5) target bundleno = 2 (0x2), region = 77 }

</bundles_post_ra>
